<compile_context>
chip_gen: v5e
topology: v5e:2x2
jax: 0.10.0
libtpu: 0.0.40
codegen_flags: <defaults>
</compile_context>

<pallas_src>
import functools

import jax
import jax.numpy as jnp
from jax.experimental import pallas as pl
from jax.experimental.pallas import tpu as pltpu


# ----------------------------------------------------------------------------
# Kernels
# ----------------------------------------------------------------------------
def revin_norm_kernel(x_ref, w_ref, b_ref, y_ref, mean_ref, std_ref, *, eps, affine):
    # x_ref: (Bb, T, C) block; w_ref / b_ref: (1, C)
    x = x_ref[...].astype(jnp.float32)                                   # (Bb, T, C)
    inv_t = jnp.float32(1.0 / x.shape[1])

    mean = jnp.sum(x, axis=1, keepdims=True) * inv_t                     # (Bb, 1, C)
    centered = x - mean                                                  # reused below
    var = jnp.sum(centered * centered, axis=1, keepdims=True) * inv_t    # biased var
    std = jnp.sqrt(var + eps)                                            # (Bb, 1, C)

    # Fold normalization + affine into one per-channel scale; divides happen
    # only on the (Bb, 1, C) slab, the per-element pass is a single FMA.
    inv_std = 1.0 / std
    if affine:
        w = w_ref[...].reshape(1, 1, -1)
        b = b_ref[...].reshape(1, 1, -1)
        y = centered * (inv_std * w) + b
    else:
        y = centered * inv_std

    y_ref[...] = y.astype(y_ref.dtype)
    mean_ref[...] = mean.astype(mean_ref.dtype)
    std_ref[...] = std.astype(std_ref.dtype)


def revin_denorm_kernel(x_ref, mean_ref, std_ref, w_ref, b_ref, y_ref, *, eps, affine):
    # x_ref: (Bb, T, C); mean_ref / std_ref: (Bb, 1, C); w_ref / b_ref: (1, C)
    x = x_ref[...].astype(jnp.float32)
    mean = mean_ref[...].astype(jnp.float32)
    std = std_ref[...].astype(jnp.float32)

    if affine:
        w = w_ref[...].reshape(1, 1, -1)
        b = b_ref[...].reshape(1, 1, -1)
        scale = std / (w + eps * eps)        # per-channel only
        shift = mean - b * scale             # per-channel only
    else:
        scale = std
        shift = mean

    # Single FMA per element.
    y_ref[...] = (x * scale + shift).astype(y_ref.dtype)


# ----------------------------------------------------------------------------
# Wrappers
# ----------------------------------------------------------------------------
def _largest_divisor_at_most(n: int, cap: int) -> int:
    cap = max(1, min(n, cap))
    for d in range(cap, 0, -1):
        if n % d == 0:
            return d
    return 1


def _pick_batch_block(B: int, T: int, C: int, target_bytes: int = 1 << 20) -> int:
    # Group batch elements so each x block is roughly `target_bytes` of f32.
    per_batch = T * C * 4
    cap = max(1, target_bytes // max(1, per_batch))
    return _largest_divisor_at_most(B, cap)


def _vmem_limit_for_block(bb: int, T: int, C: int) -> int:
    # Double-buffered x in + y out (f32) plus stats/params/temps and headroom.
    block_f32 = bb * T * C * 4
    budget = 8 * block_f32 + (2 << 20)
    return int(min(56 << 20, max(4 << 20, budget)))


class RevINPallas:
    """Pallas TPU implementation of RevIN. Statistics are returned / passed
    explicitly instead of being stashed on `self` (functional style)."""

    def __init__(self, num_features: int, eps: float = 1e-5, affine: bool = True):
        self.num_features = num_features
        self.eps = float(eps)
        self.affine = affine
        # deterministic parameter init, matching the PyTorch module
        self.affine_weight = jnp.ones((1, num_features), jnp.float32)
        self.affine_bias = jnp.zeros((1, num_features), jnp.float32)

    def norm(self, x):
        B, T, C = x.shape
        bb = _pick_batch_block(B, T, C)
        kernel = functools.partial(revin_norm_kernel, eps=self.eps, affine=self.affine)
        y, mean, std = pl.pallas_call(
            kernel,
            out_shape=(
                jax.ShapeDtypeStruct((B, T, C), x.dtype),
                jax.ShapeDtypeStruct((B, 1, C), jnp.float32),
                jax.ShapeDtypeStruct((B, 1, C), jnp.float32),
            ),
            grid_spec=pltpu.PrefetchScalarGridSpec(
                num_scalar_prefetch=0,
                grid=(B // bb,),
                in_specs=[
                    pl.BlockSpec((bb, T, C), lambda b: (b, 0, 0)),
                    pl.BlockSpec((1, C), lambda b: (0, 0)),
                    pl.BlockSpec((1, C), lambda b: (0, 0)),
                ],
                out_specs=[
                    pl.BlockSpec((bb, T, C), lambda b: (b, 0, 0)),
                    pl.BlockSpec((bb, 1, C), lambda b: (b, 0, 0)),
                    pl.BlockSpec((bb, 1, C), lambda b: (b, 0, 0)),
                ],
            ),
            compiler_params=pltpu.CompilerParams(
                dimension_semantics=("parallel",),
                vmem_limit_bytes=_vmem_limit_for_block(bb, T, C),
            ),
        )(x, self.affine_weight, self.affine_bias)
        return y, mean, std

    def denorm(self, x, mean, std):
        B, T, C = x.shape
        bb = _pick_batch_block(B, T, C)
        kernel = functools.partial(revin_denorm_kernel, eps=self.eps, affine=self.affine)
        y = pl.pallas_call(
            kernel,
            out_shape=jax.ShapeDtypeStruct((B, T, C), x.dtype),
            grid_spec=pltpu.PrefetchScalarGridSpec(
                num_scalar_prefetch=0,
                grid=(B // bb,),
                in_specs=[
                    pl.BlockSpec((bb, T, C), lambda b: (b, 0, 0)),
                    pl.BlockSpec((bb, 1, C), lambda b: (b, 0, 0)),
                    pl.BlockSpec((bb, 1, C), lambda b: (b, 0, 0)),
                    pl.BlockSpec((1, C), lambda b: (0, 0)),
                    pl.BlockSpec((1, C), lambda b: (0, 0)),
                ],
                out_specs=pl.BlockSpec((bb, T, C), lambda b: (b, 0, 0)),
            ),
            compiler_params=pltpu.CompilerParams(
                dimension_semantics=("parallel",),
                vmem_limit_bytes=_vmem_limit_for_block(bb, T, C),
            ),
        )(x, mean, std, self.affine_weight, self.affine_bias)
        return y


# ----------------------------------------------------------------------------
# Pure-JAX reference (mirrors the PyTorch forward semantics)
# ----------------------------------------------------------------------------
def revin_ref_norm(x, w, b, eps, affine):
    mean = jnp.mean(x, axis=1, keepdims=True)
    var = jnp.var(x, axis=1, keepdims=True)  # biased (unbiased=False)
    std = jnp.sqrt(var + eps)
    y = (x - mean) / std
    if affine:
        y = y * w.reshape(1, 1, -1) + b.reshape(1, 1, -1)
    return y, mean, std


def revin_ref_denorm(x, mean, std, w, b, eps, affine):
    if affine:
        x = x - b.reshape(1, 1, -1)
        x = x / (w.reshape(1, 1, -1) + eps * eps)
    return x * std + mean


# ----------------------------------------------------------------------------
if __name__ == "__main__":
    B, T, C = 4, 16, 32  # batch, sequence length, num_features
    key = jax.random.PRNGKey(0)
    x = jax.random.normal(key, (B, T, C), dtype=jnp.float32) * 3.0 + 1.5

    model = RevINPallas(num_features=C, eps=1e-5, affine=True)

    # mode == 'norm'
    y, mean, std = model.norm(x)
    jax.block_until_ready(y)
    jax.block_until_ready(mean)
    jax.block_until_ready(std)

    # mode == 'denorm'
    x_rec = model.denorm(y, mean, std)
    jax.block_until_ready(x_rec)

    # correctness vs pure-JAX reference
    y_ref, mean_ref, std_ref = revin_ref_norm(
        x, model.affine_weight, model.affine_bias, model.eps, model.affine
    )
    x_rec_ref = revin_ref_denorm(
        y_ref, mean_ref, std_ref, model.affine_weight, model.affine_bias,
        model.eps, model.affine
    )

    assert jnp.allclose(y, y_ref, atol=1e-5, rtol=1e-5)
    assert jnp.allclose(mean, mean_ref, atol=1e-5, rtol=1e-5)
    assert jnp.allclose(std, std_ref, atol=1e-5, rtol=1e-5)
    assert jnp.allclose(x_rec, x_rec_ref, atol=1e-4, rtol=1e-4)
    assert jnp.allclose(x_rec, x, atol=1e-3, rtol=1e-3)  # round-trip

    print("KERNEL_OK")
</pallas_src>

<mosaic_0001>
module attributes {stable_mosaic.version = 11 : i64} {
  func.func @revin_norm_kernel(%arg0: i32, %arg1: memref<4x16x32xf32, #tpu.memory_space<vmem>>, %arg2: memref<1x32xf32, #tpu.memory_space<vmem>>, %arg3: memref<1x32xf32, #tpu.memory_space<vmem>>, %arg4: memref<4x16x32xf32, #tpu.memory_space<vmem>>, %arg5: memref<4x1x32xf32, #tpu.memory_space<vmem>>, %arg6: memref<4x1x32xf32, #tpu.memory_space<vmem>>) attributes {dimension_semantics = [#tpu.dimension_semantics<parallel>], iteration_bounds = array<i64: 1>, scalar_prefetch = 0 : i64, scratch_operands = 0 : i64, tpu.core_type = #tpu.core_type<tc>, window_params = [{transform_indices = @transform_0, window_bounds = array<i64: 4, 16, 32>}, {pipeline_mode = #tpu.pipeline_mode<synchronous>, transform_indices = @transform_1, window_bounds = array<i64: 1, 32>}, {pipeline_mode = #tpu.pipeline_mode<synchronous>, transform_indices = @transform_2, window_bounds = array<i64: 1, 32>}, {transform_indices = @transform_3, window_bounds = array<i64: 4, 16, 32>}, {transform_indices = @transform_4, window_bounds = array<i64: 4, 1, 32>}, {transform_indices = @transform_5, window_bounds = array<i64: 4, 1, 32>}]} {
    %c0 = arith.constant 0 : index
    %c0_0 = arith.constant 0 : index
    %c0_1 = arith.constant 0 : index
    %0 = vector.load %arg1[%c0, %c0_0, %c0_1] : memref<4x16x32xf32, #tpu.memory_space<vmem>>, vector<4x16x32xf32>
    %cst = arith.constant dense<0.000000e+00> : vector<4x32xf32>
    %1 = vector.multi_reduction <add>, %0, %cst [1] : vector<4x16x32xf32> to vector<4x32xf32>
    %2 = vector.shape_cast %1 : vector<4x32xf32> to vector<4x1x32xf32>
    %cst_2 = arith.constant 6.250000e-02 : f32
    %3 = vector.broadcast %cst_2 : f32 to vector<4x1x32xf32>
    %4 = arith.mulf %2, %3 : vector<4x1x32xf32>
    %5 = vector.broadcast %4 : vector<4x1x32xf32> to vector<4x16x32xf32>
    %6 = arith.subf %0, %5 : vector<4x16x32xf32>
    %7 = arith.mulf %6, %6 : vector<4x16x32xf32>
    %cst_3 = arith.constant dense<0.000000e+00> : vector<4x32xf32>
    %8 = vector.multi_reduction <add>, %7, %cst_3 [1] : vector<4x16x32xf32> to vector<4x32xf32>
    %9 = vector.shape_cast %8 : vector<4x32xf32> to vector<4x1x32xf32>
    %cst_4 = arith.constant 6.250000e-02 : f32
    %10 = vector.broadcast %cst_4 : f32 to vector<4x1x32xf32>
    %11 = arith.mulf %9, %10 : vector<4x1x32xf32>
    %cst_5 = arith.constant 9.99999974E-6 : f32
    %12 = vector.broadcast %cst_5 : f32 to vector<4x1x32xf32>
    %13 = arith.addf %11, %12 : vector<4x1x32xf32>
    %14 = math.sqrt %13 : vector<4x1x32xf32>
    %cst_6 = arith.constant 1.000000e+00 : f32
    %15 = vector.broadcast %cst_6 : f32 to vector<4x1x32xf32>
    %16 = arith.divf %15, %14 : vector<4x1x32xf32>
    %c0_7 = arith.constant 0 : index
    %c0_8 = arith.constant 0 : index
    %17 = vector.load %arg2[%c0_7, %c0_8] : memref<1x32xf32, #tpu.memory_space<vmem>>, vector<1x32xf32>
    %18 = vector.shape_cast %17 : vector<1x32xf32> to vector<1x1x32xf32>
    %c0_9 = arith.constant 0 : index
    %c0_10 = arith.constant 0 : index
    %19 = vector.load %arg3[%c0_9, %c0_10] : memref<1x32xf32, #tpu.memory_space<vmem>>, vector<1x32xf32>
    %20 = vector.shape_cast %19 : vector<1x32xf32> to vector<1x1x32xf32>
    %21 = vector.broadcast %18 : vector<1x1x32xf32> to vector<4x1x32xf32>
    %22 = arith.mulf %16, %21 : vector<4x1x32xf32>
    %23 = vector.broadcast %22 : vector<4x1x32xf32> to vector<4x16x32xf32>
    %24 = arith.mulf %6, %23 : vector<4x16x32xf32>
    %25 = vector.broadcast %20 : vector<1x1x32xf32> to vector<4x16x32xf32>
    %26 = arith.addf %24, %25 : vector<4x16x32xf32>
    %c0_11 = arith.constant 0 : index
    %c0_12 = arith.constant 0 : index
    %c0_13 = arith.constant 0 : index
    %27 = vector.load %arg4[%c0_11, %c0_12, %c0_13] : memref<4x16x32xf32, #tpu.memory_space<vmem>>, vector<4x16x32xf32>
    tpu.vector_store %arg4[%c0_11, %c0_12, %c0_13], %26 {strides = array<i32>} : memref<4x16x32xf32, #tpu.memory_space<vmem>>, vector<4x16x32xf32>,
    %c0_14 = arith.constant 0 : index
    %c0_15 = arith.constant 0 : index
    %c0_16 = arith.constant 0 : index
    %28 = vector.load %arg5[%c0_14, %c0_15, %c0_16] : memref<4x1x32xf32, #tpu.memory_space<vmem>>, vector<4x1x32xf32>
    tpu.vector_store %arg5[%c0_14, %c0_15, %c0_16], %4 {strides = array<i32>} : memref<4x1x32xf32, #tpu.memory_space<vmem>>, vector<4x1x32xf32>,
    %c0_17 = arith.constant 0 : index
    %c0_18 = arith.constant 0 : index
    %c0_19 = arith.constant 0 : index
    %29 = vector.load %arg6[%c0_17, %c0_18, %c0_19] : memref<4x1x32xf32, #tpu.memory_space<vmem>>, vector<4x1x32xf32>
    tpu.vector_store %arg6[%c0_17, %c0_18, %c0_19], %14 {strides = array<i32>} : memref<4x1x32xf32, #tpu.memory_space<vmem>>, vector<4x1x32xf32>,
    return
  }
  func.func @transform_0(%arg0: i32) -> (i32, i32, i32) {
    %c0_i32 = arith.constant 0 : i32
    %c0_i32_0 = arith.constant 0 : i32
    %c0_i32_1 = arith.constant 0 : i32
    return %arg0, %c0_i32, %c0_i32_0 : i32, i32, i32
  }
  func.func @transform_1(%arg0: i32) -> (i32, i32) {
    %c0_i32 = arith.constant 0 : i32
    %c0_i32_0 = arith.constant 0 : i32
    %c0_i32_1 = arith.constant 0 : i32
    return %c0_i32, %c0_i32_0 : i32, i32
  }
  func.func @transform_2(%arg0: i32) -> (i32, i32) {
    %c0_i32 = arith.constant 0 : i32
    %c0_i32_0 = arith.constant 0 : i32
    %c0_i32_1 = arith.constant 0 : i32
    return %c0_i32, %c0_i32_0 : i32, i32
  }
  func.func @transform_3(%arg0: i32) -> (i32, i32, i32) {
    %c0_i32 = arith.constant 0 : i32
    %c0_i32_0 = arith.constant 0 : i32
    %c0_i32_1 = arith.constant 0 : i32
    return %arg0, %c0_i32, %c0_i32_0 : i32, i32, i32
  }
  func.func @transform_4(%arg0: i32) -> (i32, i32, i32) {
    %c0_i32 = arith.constant 0 : i32
    %c0_i32_0 = arith.constant 0 : i32
    %c0_i32_1 = arith.constant 0 : i32
    return %arg0, %c0_i32, %c0_i32_0 : i32, i32, i32
  }
  func.func @transform_5(%arg0: i32) -> (i32, i32, i32) {
    %c0_i32 = arith.constant 0 : i32
    %c0_i32_0 = arith.constant 0 : i32
    %c0_i32_1 = arith.constant 0 : i32
    return %arg0, %c0_i32, %c0_i32_0 : i32, i32, i32
  }
}

</mosaic_0001>

<bundles_post_ra>
// kernel: tpu_custom_call.1
= control target key start
LH: loop header
LB: loop body
LE: loop exit
PB: predicated region body
PF: predicated region fallthrough
CT: control target
= control target key end

     0   :  { %11 = vsyncpa [#allocation3], 0  ;;  %s714_s0 = inlined_call_operand.hbm [shape: f32[4,16,32], index: 0, kind: input, shape index: {}]   ;;  %s715_s1 = inlined_call_operand.hbm [shape: f32[1,32], index: 1, kind: input, shape index: {}]   ;;  %s716_s2 = inlined_call_operand.vmem [shape: f32[1,32], index: 2, kind: input, shape index: {}]   ;;  %s717_s3 = inlined_call_operand.hbm [shape: f32[4,16,32], index: 3, kind: output, shape index: {0}]   ;;  %s718_s4 = inlined_call_operand.hbm [shape: f32[4,1,32], index: 4, kind: output, shape index: {1}]   ;;  %s719_s5 = inlined_call_operand.hbm [shape: f32[4,1,32], index: 5, kind: output, shape index: {2}]  }
   0x1   :  { %12 = vsyncpa [#allocation6], 0 }
   0x2   :  { %13 = vsyncpa [#allocation4], 0 }
   0x3   :  { %14 = vsyncpa [#allocation9], 0  ;;  %s19_s20 = sshll.u32 %s714_s0, 4  ;;  %s521_s21 = smov [#allocation2]   ;;  %s20_s20 = int_to_ptr.hbm [resolvable:$true] %s19_s20 }
   0x4   :  { %s21_s22 = sshll.u32 %s521_s21, 4  ;;  %s33_s25 = sshll.u32 %s715_s1, 4  ;;  %s22_s22 = int_to_ptr.vmem [resolvable:$true] %s21_s22  ;;  %s34_s25 = int_to_ptr.hbm [resolvable:$true] %s33_s25 }
   0x5   :  { %s522_s26 = smov 128   ;;  %s523_s27 = smov 8  }
   0x6   :  { %27 = dma.hbm_to_vmem [thread:$0]  %s20_s20, 1024, %s22_s22, [#allocation3], %s522_s26, %s522_s26, %s523_s27  }
   0x7   :  { %s524_s28 = smov [#allocation5]  }
   0x8   :  { %s35_s29 = sshll.u32 %s524_s28, 4  ;;  %s36_s29 = int_to_ptr.vmem [resolvable:$true] %s35_s29 }
   0x9   :  { %38 = dma.hbm_to_vmem [thread:$0]  %s34_s25, 16, %s36_s29, [#allocation6]  }
   0xa   :  { %513 = dma.done.wait [#allocation3], 1024  }
   0xb   :  { %514 = vsyncadd [#allocation3], 4294966272 }
   0xc   :  { %515 = dma.done.wait [#allocation6], 16  }
   0xd   :  { %516 = vsyncadd [#allocation6], 4294967280  ;;  %vm57_vm0 = vcmask 261120   ;;  %v49_v0 = vld [vmem:[#allocation2] sm:$0xff]  ;;  %v50_v1 = vld [vmem:[#allocation2 + $0x8] sm:$0xff]  ;;  %vm303_vm1 = vcmask 253952  }
   0xe   :  { %v51_v2 = vld [vmem:[#allocation2 + $0x10] sm:$0xff]  ;;  %v58_v3 = vsel %vm57_vm0, %v49_v0, 0.0  ;;  %v59_v4 = vsel %vm57_vm0, %v50_v1, 0.0  ;;  %v52_v5 = vld [vmem:[#allocation2 + $0x18] sm:$0xff]  ;;  %v53_v7 = vld [vmem:[#allocation2 + $0x20] sm:$0xff]  ;;  %s525_s0 = smov [#allocation8]  }
   0xf   :  { %v67_v6 = vsel %vm57_vm0, %v51_v2, 0.0  ;;  %v54_v8 = vld [vmem:[#allocation2 + $0x28] sm:$0xff]  ;;  %v60_v9 = vadd.f32 %v59_v4, %v58_v3  ;;  %v68_v10 = vsel %vm57_vm0, %v52_v5, 0.0  ;;  %v76_v11 = vsel %vm57_vm0, %v53_v7, 0.0  ;;  %v55_v13 = vld [vmem:[#allocation2 + $0x30] sm:$0xff]  ;;  %v56_v14 = vld [vmem:[#allocation2 + $0x38] sm:$0xff] }
  0x10   :  { %v77_v12 = vsel %vm57_vm0, %v54_v8, 0.0  ;;  %v69_v15 = vadd.f32 %v68_v10, %v67_v6  ;;  %v85_v17 = vsel %vm57_vm0, %v55_v13, 0.0  ;;  %v86_v18 = vsel %vm57_vm0, %v56_v14, 0.0  ;;  %s577_s1 = sshll.u32 %s525_s0, 4  ;;  %s331_s7 = sshll.u32 %s718_s4, 4  ;;  %s330_s1 = int_to_ptr.vmem [resolvable:$true] %s577_s1  ;;  %s332_s7 = int_to_ptr.hbm [resolvable:$true] %s331_s7 }
  0x11   :  { %v78_v16 = vadd.f32 %v77_v12, %v76_v11  ;;  %v61_v19 = vrot.slane %v60_v9, 4  ;;  %v87_v20 = vadd.f32 %v86_v18, %v85_v17  ;;  %s526_s4 = smov 16   ;;  %s527_s8 = smov 1  }
  0x12   :  { %v70_v21 = vrot.slane %v69_v15, 4  ;;  %s528_s9 = smov [#allocation10]   ;;  %s344_s13 = sshll.u32 %s719_s5, 4  ;;  %s345_s13 = int_to_ptr.hbm [resolvable:$true] %s344_s13 }
  0x13   :  { %v79_v22 = vrot.slane %v78_v16, 4  ;;  %v62_v23 = vadd.f32 %v61_v19, %v60_v9  ;;  %v88_v24 = vrot.slane %v87_v20, 4  ;;  %s342_s10 = sshll.u32 %s528_s9, 4  ;;  %s318_s18 = sshll.u32 %s717_s3, 4  ;;  %s343_s10 = int_to_ptr.vmem [resolvable:$true] %s342_s10  ;;  %s319_s18 = int_to_ptr.hbm [resolvable:$true] %s318_s18 }
  0x14   :  { %v71_v25 = vadd.f32 %v70_v21, %v69_v15 }
  0x15   :  { %v80_v26 = vadd.f32 %v79_v22, %v78_v16  ;;  %v63_v27 = vrot.slane %v62_v23, 2  ;;  %v89_v28 = vadd.f32 %v88_v24, %v87_v20 }
  0x16   :  { %v72_v29 = vrot.slane %v71_v25, 2 }
  0x17   :  { %v81_v30 = vrot.slane %v80_v26, 2  ;;  %v64_v31 = vadd.f32 %v63_v27, %v62_v23  ;;  %v90_v32 = vrot.slane %v89_v28, 2 }
  0x18   :  { %v73_v33 = vadd.f32 %v72_v29, %v71_v25 }
  0x19   :  { %v82_v34 = vadd.f32 %v81_v30, %v80_v26  ;;  %v65_v35 = vrot.slane %v64_v31, 1  ;;  %v91_v36 = vadd.f32 %v90_v32, %v89_v28 }
  0x1a   :  { %v74_v37 = vrot.slane %v73_v33, 1 }
  0x1b   :  { %v83_v38 = vrot.slane %v82_v34, 1  ;;  %v66_v39 = vadd.f32 %v65_v35, %v64_v31  ;;  %v92_v40 = vrot.slane %v91_v36, 1 }
  0x1c   :  { %v75_v41 = vadd.f32 %v74_v37, %v73_v33 }
  0x1d   :  { %v84_v42 = vadd.f32 %v83_v38, %v82_v34  ;;  %v94_v43 = vmul.f32 0.0625, %v66_v39  ;;  %v93_v44 = vadd.f32 %v92_v40, %v91_v36 }
  0x1e   :  { %v95_v45 = vmul.f32 0.0625, %v75_v41 }
  0x1f   :  { %v96_v46 = vmul.f32 0.0625, %v84_v42  ;;  %v582_v47 = vsub.f32 %v50_v1, %v94_v43  ;;  %304 = vst.msk [vmem:[#allocation8] sm:$0x1] %vm303_vm1, %v94_v43  ;;  %v97_v48 = vmul.f32 0.0625, %v93_v44  ;;  %v585_v49 = vsub.f32 %v49_v0, %v94_v43 }
  0x20   :  { %v588_v50 = vsub.f32 %v52_v5, %v95_v45  ;;  %305 = vst.msk [vmem:[#allocation8 + $0x1] sm:$0x1] %vm303_vm1, %v95_v45  ;;  %v593_v52 = vsub.f32 %v51_v2, %v95_v45 }
  0x21   :  { %v591_v51 = vsub.f32 %v54_v8, %v96_v46  ;;  %v595_v53 = vsub.f32 %v53_v7, %v96_v46  ;;  %v107_v54 = vmul.f32 %v582_v47, %v582_v47  ;;  %306 = vst.msk [vmem:[#allocation8 + $0x2] sm:$0x1] %vm303_vm1, %v96_v46  ;;  %v600_v55 = vsub.f32 %v56_v14, %v97_v48 }
  0x22   :  { %v106_v56 = vmul.f32 %v585_v49, %v585_v49  ;;  %v604_v57 = vsub.f32 %v55_v13, %v97_v48  ;;  %v109_v58 = vmul.f32 %v588_v50, %v588_v50  ;;  %307 = vst.msk [vmem:[#allocation8 + $0x3] sm:$0x1] %vm303_vm1, %v97_v48  ;;  %v108_v60 = vmul.f32 %v593_v52, %v593_v52 }
  0x23   :  { %v111_v59 = vmul.f32 %v591_v51, %v591_v51  ;;  %v110_v61 = vmul.f32 %v595_v53, %v595_v53  ;;  %v115_v62 = vsel %vm57_vm0, %v107_v54, 0.0  ;;  %v113_v63 = vmul.f32 %v600_v55, %v600_v55  ;;  %337 = dma.vmem_to_hbm [thread:$0]  %s330_s1, 64, %s332_s7, [#allocation9], %s526_s4, %s526_s4, %s527_s8  }
  0x24   :  { %v114_v0 = vsel %vm57_vm0, %v106_v56, 0.0  ;;  %v112_v1 = vmul.f32 %v604_v57, %v604_v57  ;;  %v124_v2 = vsel %vm57_vm0, %v109_v58, 0.0  ;;  %v123_v5 = vsel %vm57_vm0, %v108_v60, 0.0 }
  0x25   :  { %v133_v3 = vsel %vm57_vm0, %v111_v59, 0.0  ;;  %v116_v4 = vadd.f32 %v115_v62, %v114_v0  ;;  %v142_v6 = vsel %vm57_vm0, %v113_v63, 0.0  ;;  %v125_v7 = vadd.f32 %v124_v2, %v123_v5 }
  0x26   :  { %v132_v8 = vsel %vm57_vm0, %v110_v61, 0.0  ;;  %v141_v9 = vsel %vm57_vm0, %v112_v1, 0.0 }
  0x27   :  { %v117_v10 = vrot.slane %v116_v4, 4  ;;  %v134_v11 = vadd.f32 %v133_v3, %v132_v8  ;;  %v143_v12 = vadd.f32 %v142_v6, %v141_v9  ;;  %v126_v13 = vrot.slane %v125_v7, 4 }
  0x29   :  { %v118_v14 = vadd.f32 %v117_v10, %v116_v4  ;;  %v135_v15 = vrot.slane %v134_v11, 4  ;;  %v144_v16 = vrot.slane %v143_v12, 4  ;;  %v127_v17 = vadd.f32 %v126_v13, %v125_v7 }
  0x2b   :  { %v119_v18 = vrot.slane %v118_v14, 2  ;;  %v136_v19 = vadd.f32 %v135_v15, %v134_v11  ;;  %v145_v20 = vadd.f32 %v144_v16, %v143_v12  ;;  %v128_v21 = vrot.slane %v127_v17, 2 }
  0x2d   :  { %v120_v22 = vadd.f32 %v119_v18, %v118_v14  ;;  %v137_v23 = vrot.slane %v136_v19, 2  ;;  %v146_v24 = vrot.slane %v145_v20, 2  ;;  %v129_v25 = vadd.f32 %v128_v21, %v127_v17 }
  0x2f   :  { %v121_v26 = vrot.slane %v120_v22, 1  ;;  %v138_v27 = vadd.f32 %v137_v23, %v136_v19  ;;  %v147_v28 = vadd.f32 %v146_v24, %v145_v20  ;;  %v130_v29 = vrot.slane %v129_v25, 1 }
  0x31   :  { %v122_v30 = vadd.f32 %v121_v26, %v120_v22  ;;  %v139_v31 = vrot.slane %v138_v27, 1  ;;  %v148_v32 = vrot.slane %v147_v28, 1  ;;  %v131_v33 = vadd.f32 %v130_v29, %v129_v25 }
  0x33   :  { %v150_v34 = vmul.f32 0.0625, %v122_v30  ;;  %v140_v35 = vadd.f32 %v139_v31, %v138_v27  ;;  %v149_v36 = vadd.f32 %v148_v32, %v147_v28  ;;  %v151_v37 = vmul.f32 0.0625, %v131_v33 }
  0x35   :  { %v154_v38 = vadd.f32 1e-05, %v150_v34  ;;  %v152_v39 = vmul.f32 0.0625, %v140_v35  ;;  %v153_v40 = vmul.f32 0.0625, %v149_v36  ;;  %v155_v41 = vadd.f32 1e-05, %v151_v37 }
  0x37   :  { %377 = vrsqrt.f32 %v154_v38  ;;  %v156_v42 = vadd.f32 1e-05, %v152_v39  ;;  %v157_v43 = vadd.f32 1e-05, %v153_v40  ;;  %vm165_vm2 = vcmp.eq.f32.partialorder %v154_v38, inf }
  0x38   :  { %379 = vrsqrt.f32 %v155_v41  ;;  %v168_v6 = vand.u32 2147483648, %v154_v38  ;;  %vm167_vm3 = vcmp.eq.f32.partialorder %v154_v38, 0.0  ;;  %vm177_vm4 = vcmp.eq.f32.partialorder %v155_v41, inf }
  0x39   :  { %381 = vrsqrt.f32 %v156_v42  ;;  %v180_v12 = vand.u32 2147483648, %v155_v41  ;;  %vm179_vm5 = vcmp.eq.f32.partialorder %v155_v41, 0.0  ;;  %vm189_vm6 = vcmp.eq.f32.partialorder %v156_v42, inf }
  0x3a   :  { %383 = vrsqrt.f32 %v157_v43  ;;  %vm191_vm7 = vcmp.eq.f32.partialorder %v156_v42, 0.0  ;;  %v192_v19 = vand.u32 2147483648, %v156_v42  ;;  %vm201_vm8 = vcmp.eq.f32.partialorder %v157_v43, inf }
  0x3b   :  { %v204_v20 = vand.u32 2147483648, %v157_v43  ;;  %vm203_vm9 = vcmp.eq.f32.partialorder %v157_v43, 0.0 }
  0x3d   :  { %v378_v44 = vpop.eup %377 }
  0x3e   :  { %v380_v45 = vpop.eup %379  ;;  %v159_v46 = vmul.f32 %v378_v44, %v154_v38 }
  0x3f   :  { %v171_v48 = vmul.f32 %v380_v45, %v155_v41  ;;  %v382_v56 = vpop.eup %381 }
  0x40   :  { %v160_v54 = vmul.f32 %v378_v44, %v159_v46  ;;  %v384_v59 = vpop.eup %383  ;;  %v183_v61 = vmul.f32 %v382_v56, %v156_v42 }
  0x41   :  { %v172_v58 = vmul.f32 %v380_v45, %v171_v48  ;;  %v195_v63 = vmul.f32 %v384_v59, %v157_v43 }
  0x42   :  { %v161_v60 = vmul.f32 0.5, %v160_v54  ;;  %v184_v1 = vmul.f32 %v382_v56, %v183_v61 }
  0x43   :  { %v173_v62 = vmul.f32 0.5, %v172_v58  ;;  %v196_v3 = vmul.f32 %v384_v59, %v195_v63 }
  0x44   :  { %v162_v0 = vsub.f32 1.5, %v161_v60  ;;  %v185_v5 = vmul.f32 0.5, %v184_v1 }
  0x45   :  { %v174_v2 = vsub.f32 1.5, %v173_v62  ;;  %v197_v8 = vmul.f32 0.5, %v196_v3 }
  0x46   :  { %v163_v4 = vmul.f32 %v378_v44, %v162_v0  ;;  %v186_v10 = vsub.f32 1.5, %v185_v5 }
  0x47   :  { %v175_v7 = vmul.f32 %v380_v45, %v174_v2  ;;  %v198_v13 = vsub.f32 1.5, %v197_v8 }
  0x48   :  { %v164_v9 = vmul.f32 %v163_v4, %v154_v38  ;;  %v187_v15 = vmul.f32 %v382_v56, %v186_v10 }
  0x49   :  { %v176_v11 = vmul.f32 %v175_v7, %v155_v41  ;;  %v199_v18 = vmul.f32 %v384_v59, %v198_v13  ;;  %v266_v59 = vld [vmem:[#allocation5] sm:$0x1] }
  0x4a   :  { %v166_v14 = vsel %vm165_vm2, %v154_v38, %v164_v9  ;;  %v188_v22 = vmul.f32 %v187_v15, %v156_v42 }
  0x4b   :  { %v169_v16 = vsel %vm167_vm3, %v168_v6, %v166_v14  ;;  %v178_v17 = vsel %vm177_vm4, %v155_v41, %v176_v11  ;;  %v200_v23 = vmul.f32 %v199_v18, %v157_v43  ;;  %v376_v14 = vld [vmem:[%s716_s2] ss:$0 sm:$0xff]  ;;  %s529_s2 = smov [#allocation7]  }
  0x4c   :  { %385 = vrcp.f32 %v169_v16  ;;  %308 = vst.msk [vmem:[#allocation10] sm:$0x1] %vm303_vm1, %v169_v16  ;;  %v181_v21 = vsel %vm179_vm5, %v180_v12, %v178_v17  ;;  %v190_v24 = vsel %vm189_vm6, %v156_v42, %v188_v22  ;;  %v215_v29 = vand.u32 2147483647, %v169_v16  ;;  %s316_s15 = sshll.u32 %s529_s2, 4  ;;  %s317_s15 = int_to_ptr.vmem [resolvable:$true] %s316_s15 }
  0x4d   :  { %387 = vrcp.f32 %v181_v21  ;;  %309 = vst.msk [vmem:[#allocation10 + $0x1] sm:$0x1] %vm303_vm1, %v181_v21  ;;  %v202_v25 = vsel %vm201_vm8, %v157_v43, %v200_v23  ;;  %v193_v26 = vsel %vm191_vm7, %v192_v19, %v190_v24  ;;  %v217_v30 = vand.u32 2147483648, %v169_v16 }
  0x4e   :  { %v637_v27 = vsel %vm203_vm9, %v204_v20, %v202_v25  ;;  %389 = vrcp.f32 %v193_v26  ;;  %310 = vst.msk [vmem:[#allocation10 + $0x2] sm:$0x1] %vm303_vm1, %v193_v26  ;;  %v230_v33 = vand.u32 2147483647, %v181_v21  ;;  %v232_v34 = vand.u32 2147483648, %v181_v21 }
  0x4f   :  { %391 = vrcp.f32 %v637_v27  ;;  %311 = vst.msk [vmem:[#allocation10 + $0x3] sm:$0x1] %vm303_vm1, %v637_v27  ;;  %vm211_vm10 = vweird.f32 %v169_v16  ;;  %vm646_vm12 = vcmp.eq.f32.partialorder %v215_v29, 8.507059e+37  ;;  %v218_v38 = vor.u32 1.1754944e-38, %v217_v30 }
  0x50   :  { %350 = dma.vmem_to_hbm [thread:$0]  %s343_s10, 64, %s345_s13, [#allocation9], %s526_s4, %s526_s4, %s527_s8   ;;  %vm226_vm13 = vweird.f32 %v181_v21  ;;  %vm654_vm1 = vcmp.eq.f32.partialorder %v230_v33, 8.507059e+37  ;;  %v233_v45 = vor.u32 1.1754944e-38, %v232_v34  ;;  %vm241_vm2 = vweird.f32 %v193_v26 }
  0x51   :  { %v247_v56 = vand.u32 2147483648, %v193_v26  ;;  %v245_v62 = vand.u32 2147483647, %v193_v26  ;;  %vm256_vm5 = vweird.f32 %v637_v27  ;;  %v260_v2 = vand.u32 2147483647, %v637_v27 }
  0x52   :  { %v386_v28 = vpop.eup %385  ;;  %v262_v5 = vand.u32 2147483648, %v637_v27 }
  0x53   :  { %v207_v31 = vmul.f32 %v386_v28, %v169_v16  ;;  %v388_v32 = vpop.eup %387  ;;  %vm212_vm11 = vweird.f32 %v386_v28  ;;  %v248_v9 = vor.u32 1.1754944e-38, %v247_v56  ;;  %vm246_vm8 = vcmp.eq.f32.partialorder %v245_v62, 8.507059e+37 }
  0x54   :  { %v222_v36 = vmul.f32 %v388_v32, %v181_v21  ;;  %v390_v39 = vpop.eup %389  ;;  %vm227_vm14 = vweird.f32 %v388_v32  ;;  %vm650_vm15 = vmor %vm211_vm10, %vm212_vm11  ;;  %vm261_vm10 = vcmp.eq.f32.partialorder %v260_v2, 8.507059e+37  ;;  %v263_v19 = vor.u32 1.1754944e-38, %v262_v5 }
  0x55   :  { %v208_v35 = vsub.f32 1.0, %v207_v31  ;;  %v392_v42 = vpop.eup %391  ;;  %v237_v46 = vmul.f32 %v390_v39, %v193_v26  ;;  %vm659_vm3 = vmor %vm226_vm13, %vm227_vm14  ;;  %vm242_vm4 = vweird.f32 %v390_v39 }
  0x56   :  { %v223_v41 = vsub.f32 1.0, %v222_v36  ;;  %v252_v58 = vmul.f32 %v392_v42, %v637_v27  ;;  %vm257_vm6 = vweird.f32 %v392_v42  ;;  %vm673_vm7 = vmor %vm241_vm2, %vm242_vm4 }
  0x57   :  { %v209_v40 = vmul.f32 %v386_v28, %v208_v35  ;;  %v238_v61 = vsub.f32 1.0, %v237_v46  ;;  %vm684_vm9 = vmor %vm256_vm5, %vm257_vm6 }
  0x58   :  { %v224_v54 = vmul.f32 %v388_v32, %v223_v41  ;;  %v253_v1 = vsub.f32 1.0, %v252_v58 }
  0x59   :  { %v210_v48 = vadd.f32 %v386_v28, %v209_v40  ;;  %v239_v4 = vmul.f32 %v390_v39, %v238_v61 }
  0x5a   :  { %v225_v0 = vadd.f32 %v388_v32, %v224_v54  ;;  %v254_v10 = vmul.f32 %v392_v42, %v253_v1 }
  0x5b   :  { %v214_v63 = vsel %vm650_vm15, %v386_v28, %v210_v48  ;;  %v240_v12 = vadd.f32 %v390_v39, %v239_v4 }
  0x5c   :  { %v219_v3 = vsel %vm646_vm12, %v218_v38, %v214_v63  ;;  %v229_v7 = vsel %vm659_vm3, %v388_v32, %v225_v0  ;;  %v255_v16 = vadd.f32 %v392_v42, %v254_v10 }
  0x5d   :  { %v268_v6 = vmul.f32 %v266_v59, %v219_v3  ;;  %v234_v11 = vsel %vm654_vm1, %v233_v45, %v229_v7  ;;  %v244_v18 = vsel %vm673_vm7, %v390_v39, %v240_v12 }
  0x5e   :  { %v269_v15 = vmul.f32 %v266_v59, %v234_v11  ;;  %v249_v23 = vsel %vm246_vm8, %v248_v9, %v244_v18  ;;  %v259_v25 = vsel %vm684_vm9, %v392_v42, %v255_v16 }
  0x5f   :  { %v272_v13 = vperm.slane %v268_v6, 0  ;;  %v270_v24 = vmul.f32 %v266_v59, %v249_v23  ;;  %v264_v31 = vsel %vm261_vm10, %v263_v19, %v259_v25 }
  0x60   :  { %v273_v22 = vperm.slane %v269_v15, 0  ;;  %v271_v33 = vmul.f32 %v266_v59, %v264_v31 }
  0x61   :  { %v276_v20 = vmul.f32 %v272_v13, %v585_v49  ;;  %v277_v21 = vmul.f32 %v272_v13, %v582_v47  ;;  %v274_v30 = vperm.slane %v270_v24, 0 }
  0x62   :  { %v278_v28 = vmul.f32 %v273_v22, %v593_v52  ;;  %v279_v29 = vmul.f32 %v273_v22, %v588_v50  ;;  %v275_v35 = vperm.slane %v271_v33, 0 }
  0x63   :  { %v287_v26 = vadd.f32 %v376_v14, %v276_v20  ;;  %v288_v27 = vadd.f32 %v376_v14, %v277_v21  ;;  %v280_v47 = vmul.f32 %v274_v30, %v595_v53  ;;  %v281_v34 = vmul.f32 %v274_v30, %v591_v51 }
  0x64   :  { %v289_v32 = vadd.f32 %v376_v14, %v278_v28  ;;  %v290_v49 = vadd.f32 %v376_v14, %v279_v29  ;;  %v282_v36 = vmul.f32 %v275_v35, %v604_v57  ;;  %v283_v37 = vmul.f32 %v275_v35, %v600_v55 }
  0x65   :  { %295 = vst.msk [vmem:[#allocation7] sm:$0xff] %vm57_vm0, %v287_v26  ;;  %v291_v52 = vadd.f32 %v376_v14, %v280_v47  ;;  %v292_v50 = vadd.f32 %v376_v14, %v281_v34 }
  0x66   :  { %296 = vst.msk [vmem:[#allocation7 + $0x8] sm:$0xff] %vm57_vm0, %v288_v27  ;;  %v293_v51 = vadd.f32 %v376_v14, %v282_v36  ;;  %v294_v53 = vadd.f32 %v376_v14, %v283_v37 }
  0x67   :  { %297 = vst.msk [vmem:[#allocation7 + $0x10] sm:$0xff] %vm57_vm0, %v289_v32 }
  0x68   :  { %298 = vst.msk [vmem:[#allocation7 + $0x18] sm:$0xff] %vm57_vm0, %v290_v49 }
  0x69   :  { %299 = vst.msk [vmem:[#allocation7 + $0x20] sm:$0xff] %vm57_vm0, %v291_v52 }
  0x6a   :  { %300 = vst.msk [vmem:[#allocation7 + $0x28] sm:$0xff] %vm57_vm0, %v292_v50 }
  0x6b   :  { %301 = vst.msk [vmem:[#allocation7 + $0x30] sm:$0xff] %vm57_vm0, %v293_v51 }
  0x6c   :  { %302 = vst.msk [vmem:[#allocation7 + $0x38] sm:$0xff] %vm57_vm0, %v294_v53 }
  0x6d   :  { %324 = dma.vmem_to_hbm [thread:$0]  %s317_s15, 1024, %s319_s18, [#allocation4], %s522_s26, %s522_s26, %s523_s27  }
  0x6e   :  { %517 = dma.done.wait [#allocation4], 1024  }
  0x6f   :  { %518 = vsyncadd [#allocation4], 4294966272 }
  0x70   :  { %519 = dma.done.wait [#allocation9], 128  }
  0x71   :  { %520 = vsyncadd [#allocation9], 4294967168 }
  0x72   :  { %363 = vsyncpa [#allocation3], 1 }
  0x73   :  { %364 = vsyncpa [#allocation6], 1 }
  0x74   :  { %365 = vsyncpa [#allocation4], 1 }
  0x75   :  { %366 = vsyncpa [#allocation9], 1 }

</bundles_post_ra>
